<compile_context>
chip_gen: v7x
topology: tpu7x:2x2x1
jax: 0.10.0
libtpu: 0.0.40
codegen_flags: <defaults>
</compile_context>

<pallas_src>
import functools

import jax
import jax.numpy as jnp
from jax.experimental import pallas as pl
from jax.experimental.pallas import tpu as pltpu

# ---- config values (synthetic: configparser values are not available) ----
N_EMBED = 32
N_LAYERS = 4
HIDDEN = 4 * N_EMBED
SCALE = N_LAYERS / (3.0 ** (-0.25))   # = n_layers * 3**0.25  (module-faithful)

COMPUTE_DTYPE = jnp.bfloat16
LANES = 128


def ffn_kernel(x_ref, w1_ref, b1_ref, w2_ref, b2_ref, o_ref):
    # x_ref : (tm_p, PACK*C)    bf16, PACK tokens packed per 128-lane row
    # w1_ref: (PACK*C, PACK*H)  bf16 block-diagonal copies of W1
    # b1_ref: (1, PACK*H)       f32 tiled bias
    # w2_ref: (PACK*H, PACK*C)  bf16 block-diagonal copies of SCALE*W2
    # b2_ref: (1, PACK*C)       f32 tiled SCALE*b2
    h = jnp.dot(x_ref[...], w1_ref[...], preferred_element_type=jnp.float32)
    h = jnp.maximum(h + b1_ref[...], 0.0)
    y = jnp.dot(h.astype(w2_ref.dtype), w2_ref[...],
                preferred_element_type=jnp.float32)
    o_ref[...] = (y + b2_ref[...]).astype(o_ref.dtype)


def pack_params(w1, b1, w2, b2, *, pack=None):
    """One-time weight preprocessing. Call ONCE per parameter version, not per step.

    w1: (C, H), b1: (1, H), w2: (H, C), b2: (1, C), all f32, stored as (in, out)
    so x @ W == x @ W_torch.T.  Returns block-diagonal bf16 weights operating on
    the lane-packed activation layout, with the static output SCALE folded into
    the second layer (f32 multiply before the bf16 cast).
    """
    C, H = w1.shape
    if pack is None:
        pack = LANES // C if LANES % C == 0 else 1
    eye = jnp.eye(pack, dtype=jnp.float32)
    w1w = jnp.kron(eye, w1.astype(jnp.float32)).astype(COMPUTE_DTYPE)          # (pack*C, pack*H)
    w2w = jnp.kron(eye, w2.astype(jnp.float32) * SCALE).astype(COMPUTE_DTYPE)  # (pack*H, pack*C)
    b1w = jnp.tile(b1.reshape(1, H).astype(jnp.float32), (1, pack))            # (1, pack*H)
    b2w = jnp.tile(b2.reshape(1, C).astype(jnp.float32) * SCALE, (1, pack))    # (1, pack*C)
    return w1w, b1w, w2w, b2w


@functools.partial(jax.jit, static_argnames=("tm",))
def feed_forward(x, w1w, b1w, w2w, b2w, *, tm=8192):
    """FeedForward of ChessGen.

    x : (B, T, C) activations (bf16 preferred).
    w1w/b1w/w2w/b2w : packed params from pack_params().
    tm: tokens (rows of the flattened (B*T, C) view) per grid step.  8192 fits the
        default scoped VMEM on every generation; larger values trigger an explicit
        vmem_limit_bytes (capped for v7x's 64 MiB physical VMEM).
    """
    B, T, C = x.shape
    M = B * T
    pack = w1w.shape[0] // C
    H = w1w.shape[1] // pack
    PACKED = pack * C

    # Lane-dense packing: PACK tokens per 128-lane row -> unmasked full-lane stores.
    x2d = x.reshape(M, C).astype(COMPUTE_DTYPE)
    if M % pack:
        # TODO(synk): ragged tail falls back to pad+slice (one extra pass over the
        # activations); keep B*T a multiple of 4 in production to stay on the fast path.
        pad = pack - M % pack
        x2d = jnp.concatenate([x2d, jnp.zeros((pad, C), x2d.dtype)], axis=0)
    else:
        pad = 0
    Mp = (M + pad) // pack
    xp = x2d.reshape(Mp, PACKED)                     # free row-major reshape

    # Row tile (in packed rows): large to amortize the ~0.35 us per-step overhead,
    # a multiple of 8 sublanes, but never a single grid step when there is enough
    # work (>= 2 steps so v7x's two TensorCores both get row tiles).
    tm_p = max(8, (tm // pack) // 8 * 8)
    if Mp <= 8:
        tm_p = Mp                                    # tiny problem: whole array, 1 step
    else:
        max_tile = ((Mp + 1) // 2 + 7) // 8 * 8      # ceil(Mp/2) rounded up to 8
        tm_p = min(tm_p, max(8, max_tile))           # guarantees >= 2 grid steps
    grid = (pl.cdiv(Mp, tm_p),)

    # VMEM budget per grid step (double-buffered x/out tiles + in-kernel h/y temps
    # + resident double-buffered weights).  Only override the scoped limit if the
    # default (16 MiB v5e / 32 MiB v6e,v7x) would be exceeded; cap at v7x physical.
    bytes_per_row = (2 * 2 * PACKED * 2              # x + out tiles, bf16, 2 buffers
                     + pack * H * (4 + 2)            # f32 h + bf16 copy of h
                     + PACKED * 4)                   # f32 y before output cast
    weight_bytes = 2 * (w1w.size + w2w.size) * 2 + 2 * (b1w.size + b2w.size) * 4
    vmem_est = int(tm_p * bytes_per_row + weight_bytes)
    vmem_limit = None
    if vmem_est > 14 * 2**20:
        vmem_limit = int(min(vmem_est * 3 // 2, 64 * 2**20))

    cost = pl.CostEstimate(
        flops=4 * M * C * H,                         # 2 matmuls, 2*M*C*H each (logical)
        transcendentals=0,
        bytes_accessed=int(2 * xp.size * 2           # x in + out, bf16
                           + (w1w.size + w2w.size) * 2
                           + (b1w.size + b2w.size) * 4),
    )

    outp = pl.pallas_call(
        ffn_kernel,
        out_shape=jax.ShapeDtypeStruct((Mp, PACKED), COMPUTE_DTYPE),
        grid_spec=pltpu.PrefetchScalarGridSpec(
            num_scalar_prefetch=0,
            grid=grid,
            in_specs=[
                pl.BlockSpec((tm_p, PACKED), lambda i: (i, 0)),        # packed x
                pl.BlockSpec((PACKED, pack * H), lambda i: (0, 0)),    # W1 (resident)
                pl.BlockSpec((1, pack * H), lambda i: (0, 0)),         # b1
                pl.BlockSpec((pack * H, PACKED), lambda i: (0, 0)),    # SCALE*W2
                pl.BlockSpec((1, PACKED), lambda i: (0, 0)),           # SCALE*b2
            ],
            out_specs=pl.BlockSpec((tm_p, PACKED), lambda i: (i, 0)),
        ),
        compiler_params=pltpu.CompilerParams(
            # 1-D parallel grid: v7x's two TensorCores split the row tiles.
            dimension_semantics=("parallel",),
            vmem_limit_bytes=vmem_limit,
        ),
        cost_estimate=cost,
    )(xp, w1w, b1w, w2w, b2w)

    out2d = outp.reshape(Mp * pack, C)               # free reshape
    if pad:
        out2d = out2d[:M]
    return out2d.reshape(B, T, C)


def init_params(key, n_embed, hidden):
    """Deterministic init mimicking nn.Linear's U(-1/sqrt(fan_in), 1/sqrt(fan_in))."""
    k1, k2, k3, k4 = jax.random.split(key, 4)
    bound1 = 1.0 / jnp.sqrt(n_embed)
    bound2 = 1.0 / jnp.sqrt(hidden)
    # stored as (in, out) so the kernel does x @ W (equivalent to x @ W_torch.T)
    w1 = jax.random.uniform(k1, (n_embed, hidden), jnp.float32, -bound1, bound1)
    b1 = jax.random.uniform(k2, (1, hidden), jnp.float32, -bound1, bound1)
    w2 = jax.random.uniform(k3, (hidden, n_embed), jnp.float32, -bound2, bound2)
    b2 = jax.random.uniform(k4, (1, n_embed), jnp.float32, -bound2, bound2)
    return w1, b1, w2, b2


def reference(x, w1, b1, w2, b2):
    """Module-faithful f32 reference (same bf16-rounded input values)."""
    xf = x.astype(jnp.float32)
    h = jnp.maximum(xf @ w1 + b1[0], 0.0)
    return (h @ w2 + b2[0]) * SCALE


if __name__ == "__main__":
    key = jax.random.PRNGKey(0)
    kx, kp = jax.random.split(key)

    B, T = 2, 8
    # Transformer activations assumed bf16 (kernel output is pinned to bf16 too).
    x = jax.random.normal(kx, (B, T, N_EMBED), dtype=jnp.float32).astype(jnp.bfloat16)
    w1, b1, w2, b2 = init_params(kp, N_EMBED, HIDDEN)

    # One-time parameter packing (outside the per-forward hot path).
    w1w, b1w, w2w, b2w = pack_params(w1, b1, w2, b2)
    w1w, b1w, w2w, b2w = jax.block_until_ready((w1w, b1w, w2w, b2w))

    out = feed_forward(x, w1w, b1w, w2w, b2w)
    out = jax.block_until_ready(out)

    ref = reference(x, w1, b1, w2, b2)
    assert out.shape == (B, T, N_EMBED)
    assert out.dtype == COMPUTE_DTYPE
    err = float(jnp.max(jnp.abs(out.astype(jnp.float32) - ref)))
    assert jnp.allclose(out.astype(jnp.float32), ref, atol=6e-2, rtol=6e-2), (
        f"mismatch vs JAX reference (max abs err {err})")

    print("KERNEL_OK")
</pallas_src>

<mosaic_0001>
module attributes {stable_mosaic.version = 11 : i64} {
  func.func @ffn_kernel(%arg0: i32, %arg1: memref<4x128xbf16, #tpu.memory_space<vmem>>, %arg2: memref<128x512xbf16, #tpu.memory_space<vmem>>, %arg3: memref<1x512xf32, #tpu.memory_space<vmem>>, %arg4: memref<512x128xbf16, #tpu.memory_space<vmem>>, %arg5: memref<1x128xf32, #tpu.memory_space<vmem>>, %arg6: memref<4x128xbf16, #tpu.memory_space<vmem>>) attributes {dimension_semantics = [#tpu.dimension_semantics<parallel>], iteration_bounds = array<i64: 1>, scalar_prefetch = 0 : i64, scratch_operands = 0 : i64, tpu.core_type = #tpu.core_type<tc>, window_params = [{transform_indices = @transform_0, window_bounds = array<i64: 4, 128>}, {pipeline_mode = #tpu.pipeline_mode<synchronous>, transform_indices = @transform_1, window_bounds = array<i64: 128, 512>}, {pipeline_mode = #tpu.pipeline_mode<synchronous>, transform_indices = @transform_2, window_bounds = array<i64: 1, 512>}, {pipeline_mode = #tpu.pipeline_mode<synchronous>, transform_indices = @transform_3, window_bounds = array<i64: 512, 128>}, {pipeline_mode = #tpu.pipeline_mode<synchronous>, transform_indices = @transform_4, window_bounds = array<i64: 1, 128>}, {transform_indices = @transform_5, window_bounds = array<i64: 4, 128>}]} {
    %c0 = arith.constant 0 : index
    %c0_0 = arith.constant 0 : index
    %0 = vector.load %arg1[%c0, %c0_0] : memref<4x128xbf16, #tpu.memory_space<vmem>>, vector<4x128xbf16>
    %c0_1 = arith.constant 0 : index
    %c0_2 = arith.constant 0 : index
    %1 = vector.load %arg2[%c0_1, %c0_2] : memref<128x512xbf16, #tpu.memory_space<vmem>>, vector<128x512xbf16>
    %cst = arith.constant dense<0.000000e+00> : vector<4x512xf32>
    %2 = tpu.matmul %0, %1, %cst {dimension_numbers = #tpu.dot_dimension_numbers<[1], [0], [0], [1], [0, 0, 1, 1], [], []>} : vector<4x128xbf16>, vector<128x512xbf16>, vector<4x512xf32> -> vector<4x512xf32>
    %c0_3 = arith.constant 0 : index
    %c0_4 = arith.constant 0 : index
    %3 = vector.load %arg3[%c0_3, %c0_4] : memref<1x512xf32, #tpu.memory_space<vmem>>, vector<1x512xf32>
    %4 = vector.broadcast %3 : vector<1x512xf32> to vector<4x512xf32>
    %5 = arith.addf %2, %4 : vector<4x512xf32>
    %cst_5 = arith.constant 0.000000e+00 : f32
    %6 = vector.broadcast %cst_5 : f32 to vector<4x512xf32>
    %7 = arith.maximumf %5, %6 : vector<4x512xf32>
    %8 = arith.truncf %7 : vector<4x512xf32> to vector<4x512xbf16>
    %c0_6 = arith.constant 0 : index
    %c0_7 = arith.constant 0 : index
    %9 = vector.load %arg4[%c0_6, %c0_7] : memref<512x128xbf16, #tpu.memory_space<vmem>>, vector<512x128xbf16>
    %cst_8 = arith.constant dense<0.000000e+00> : vector<4x128xf32>
    %10 = tpu.matmul %8, %9, %cst_8 {dimension_numbers = #tpu.dot_dimension_numbers<[1], [0], [0], [1], [0, 0, 1, 1], [], []>} : vector<4x512xbf16>, vector<512x128xbf16>, vector<4x128xf32> -> vector<4x128xf32>
    %c0_9 = arith.constant 0 : index
    %c0_10 = arith.constant 0 : index
    %11 = vector.load %arg5[%c0_9, %c0_10] : memref<1x128xf32, #tpu.memory_space<vmem>>, vector<1x128xf32>
    %12 = vector.broadcast %11 : vector<1x128xf32> to vector<4x128xf32>
    %13 = arith.addf %10, %12 : vector<4x128xf32>
    %14 = arith.truncf %13 : vector<4x128xf32> to vector<4x128xbf16>
    %c0_11 = arith.constant 0 : index
    %c0_12 = arith.constant 0 : index
    %15 = vector.load %arg6[%c0_11, %c0_12] : memref<4x128xbf16, #tpu.memory_space<vmem>>, vector<4x128xbf16>
    tpu.vector_store %arg6[%c0_11, %c0_12], %14 {strides = array<i32>} : memref<4x128xbf16, #tpu.memory_space<vmem>>, vector<4x128xbf16>,
    return
  }
  func.func @transform_0(%arg0: i32) -> (i32, i32) {
    %c0_i32 = arith.constant 0 : i32
    %c0_i32_0 = arith.constant 0 : i32
    return %arg0, %c0_i32 : i32, i32
  }
  func.func @transform_1(%arg0: i32) -> (i32, i32) {
    %c0_i32 = arith.constant 0 : i32
    %c0_i32_0 = arith.constant 0 : i32
    %c0_i32_1 = arith.constant 0 : i32
    return %c0_i32, %c0_i32_0 : i32, i32
  }
  func.func @transform_2(%arg0: i32) -> (i32, i32) {
    %c0_i32 = arith.constant 0 : i32
    %c0_i32_0 = arith.constant 0 : i32
    %c0_i32_1 = arith.constant 0 : i32
    return %c0_i32, %c0_i32_0 : i32, i32
  }
  func.func @transform_3(%arg0: i32) -> (i32, i32) {
    %c0_i32 = arith.constant 0 : i32
    %c0_i32_0 = arith.constant 0 : i32
    %c0_i32_1 = arith.constant 0 : i32
    return %c0_i32, %c0_i32_0 : i32, i32
  }
  func.func @transform_4(%arg0: i32) -> (i32, i32) {
    %c0_i32 = arith.constant 0 : i32
    %c0_i32_0 = arith.constant 0 : i32
    %c0_i32_1 = arith.constant 0 : i32
    return %c0_i32, %c0_i32_0 : i32, i32
  }
  func.func @transform_5(%arg0: i32) -> (i32, i32) {
    %c0_i32 = arith.constant 0 : i32
    %c0_i32_0 = arith.constant 0 : i32
    return %arg0, %c0_i32 : i32, i32
  }
}

</mosaic_0001>

<bundles_post_ra>
// kernel: feed_forward.1
= control target key start
LH: loop header
LB: loop body
LE: loop exit
PB: predicated region body
PF: predicated region fallthrough
CT: control target
= control target key end

     0   :  { %10 = vsyncpa [#allocation3], 0  ;;  %s1022_s0 = inlined_call_operand.vmem [shape: bf16[4,128], index: 0, kind: input, shape index: {}]   ;;  %s1023_s1 = inlined_call_operand.hbm [shape: bf16[128,512], index: 1, kind: input, shape index: {}]   ;;  %s1024_s2 = inlined_call_operand.vmem [shape: f32[1,512], index: 2, kind: input, shape index: {}]   ;;  %s1025_s3 = inlined_call_operand.hbm [shape: bf16[512,128], index: 3, kind: input, shape index: {}]   ;;  %s1026_s4 = inlined_call_operand.vmem [shape: f32[1,128], index: 4, kind: input, shape index: {}]   ;;  %s1027_s5 = inlined_call_operand.vmem [shape: bf16[4,128], index: 5, kind: output, shape index: {}]  }
   0x1   :  { %11 = vsyncpa [#allocation5], 0  ;;  %s949_s18 = smov [#allocation2]   ;;  %s901_s22 = scalar_lea.hbm %s1023_s1, 4096 }
   0x2   :  { %s19_s19 = sshll.u32 %s949_s18, 4  ;;  %p902_p0 = scmp.ne.s32.totalorder %s1023_s1, %s901_s22  ;;  %s20_s19 = int_to_ptr.vmem [resolvable:$true] %s19_s19 }
   0x3   :  { %p905_p1 = scmp.lt.u32.totalorder %s901_s22, %s1023_s1 }
   0x5   :  { %p907_p2 = pnand %p905_p1, %p902_p0 }
   0x7   :  { %910 = shalt.err (!%p907_p2)
}
   0x8   :  { %s911_s27 = scalar_lea.vmem %s20_s19, 4096  ;;  %p916_p4 = scmp.lt.s32.totalorder %s20_s19, %s20_s19 }
   0x9   :  { %p912_p3 = scmp.ne.s32.totalorder %s20_s19, %s911_s27  ;;  %p917_p5 = scmp.lt.s32.totalorder %s911_s27, %s911_s27 }
   0xb   :  { %p918_p6 = por %p917_p5, %p916_p4 }
   0xd   :  { %p919_p7 = pnand %p918_p6, %p912_p3 }
   0xf   :  { %922 = shalt.err (!%p919_p7)
}
  0x10   :  { %s950_s28 = smov 256   ;;  %s951_s29 = smov 16  }
  0x11   :  { %25 = dma.hbm_to_vmem [thread:$0]  %s1023_s1, 4096, %s20_s19, [#allocation3], %s950_s28, %s950_s28, %s951_s29  }
  0x12   :  { %s952_s7 = smov [#allocation4]   ;;  %s923_s11 = scalar_lea.hbm %s1025_s3, 4096 }
  0x13   :  { %s33_s8 = sshll.u32 %s952_s7, 4  ;;  %p924_p8 = scmp.ne.s32.totalorder %s1025_s3, %s923_s11  ;;  %s34_s8 = int_to_ptr.vmem [resolvable:$true] %s33_s8 }
  0x14   :  { %p927_p9 = scmp.lt.u32.totalorder %s923_s11, %s1025_s3 }
  0x16   :  { %p929_p10 = pnand %p927_p9, %p924_p8 }
  0x18   :  { %932 = shalt.err (!%p929_p10)
}
  0x19   :  { %s933_s16 = scalar_lea.vmem %s34_s8, 4096  ;;  %p938_p12 = scmp.lt.s32.totalorder %s34_s8, %s34_s8 }
  0x1a   :  { %p934_p11 = scmp.ne.s32.totalorder %s34_s8, %s933_s16  ;;  %p939_p13 = scmp.lt.s32.totalorder %s933_s16, %s933_s16 }
  0x1c   :  { %p940_p0 = por %p939_p13, %p938_p12 }
  0x1e   :  { %p941_p1 = pnand %p940_p0, %p934_p11 }
  0x20   :  { %944 = shalt.err (!%p941_p1)
}
  0x21   :  { %s953_s1 = smov 64   ;;  %s954_s17 = smov 4  }
  0x22   :  { %39 = dma.hbm_to_vmem [thread:$0]  %s1025_s3, 4096, %s34_s8, [#allocation5], %s953_s1, %s953_s1, %s954_s17  }
  0x23   :  { %945 = dma.done.wait [#allocation3], 4096  }
  0x24   :  { %946 = vsyncadd [#allocation3], 4294963200 }
  0x25   :  { %947 = dma.done.wait [#allocation5], 4096  }
  0x26   :  { %948 = vsyncadd [#allocation5], 4294963200  ;;  %v955_v0 = vmov 0   ;;  %v821_v1 = vld [vmem:[#allocation2 + $0x4] ss:$16 sps:$4 sm:$0xff]   ;;  %v873_v38 = vld [vmem:[#allocation4 + $0x48] sm:$0xff]  }
  0x27   :  { %296 = vmatprep.mubr.bf16.mxu0 %v955_v0  ;;  %337 = vmatprep.mubr.bf16.mxu1 %v955_v0  ;;  %v823_v2 = vld [vmem:[#allocation2 + $0xc] ss:$16 sps:$4 sm:$0xff]   ;;  %v825_v3 = vld [vmem:[#allocation2] ss:$16 sps:$4 sm:$0xff]   ;;  %v826_v4 = vld [vmem:[#allocation2 + $0x8] ss:$16 sps:$4 sm:$0xff]  }
  0x28   :  { %264 = vmatprep.subr.bf16.mxu0 %v821_v1  ;;  %305 = vmatprep.subr.bf16.mxu1 %v823_v2  ;;  %v827_v5 = vld [vmem:[#allocation2 + $0x24] ss:$16 sps:$4 sm:$0xff]   ;;  %v829_v6 = vld [vmem:[#allocation2 + $0x2c] ss:$16 sps:$4 sm:$0xff]   ;;  %v831_v7 = vld [vmem:[#allocation2 + $0x20] ss:$16 sps:$4 sm:$0xff]   ;;  %v84_v2 = vlaneseq }
  0x29   :  { %265 = vmatpush1.bf16.msra.mxu0 %v825_v3  ;;  %306 = vmatpush1.bf16.msra.mxu1 %v826_v4  ;;  %v832_v8 = vld [vmem:[#allocation2 + $0x28] ss:$16 sps:$4 sm:$0xff]   ;;  %v833_v9 = vld [vmem:[#allocation2 + $0x44] ss:$16 sps:$4 sm:$0xff]   ;;  %v835_v10 = vld [vmem:[#allocation2 + $0x4c] ss:$16 sps:$4 sm:$0xff]  }
  0x2a   :  { %266 = vmatprep.subr.bf16.mxu0 %v827_v5  ;;  %307 = vmatprep.subr.bf16.mxu1 %v829_v6  ;;  %v837_v11 = vld [vmem:[#allocation2 + $0x40] ss:$16 sps:$4 sm:$0xff]   ;;  %v838_v12 = vld [vmem:[#allocation2 + $0x48] ss:$16 sps:$4 sm:$0xff]   ;;  %v839_v13 = vld [vmem:[#allocation2 + $0x64] ss:$16 sps:$4 sm:$0xff]  }
  0x2b   :  { %v841_v14 = vld [vmem:[#allocation2 + $0x6c] ss:$16 sps:$4 sm:$0xff]   ;;  %v843_v15 = vld [vmem:[#allocation2 + $0x60] ss:$16 sps:$4 sm:$0xff]   ;;  %v844_v16 = vld [vmem:[#allocation2 + $0x68] ss:$16 sps:$4 sm:$0xff]  }
  0x2c   :  { %v845_v17 = vld [vmem:[#allocation2 + $0x84] ss:$16 sps:$4 sm:$0xff]   ;;  %v847_v18 = vld [vmem:[#allocation2 + $0x8c] ss:$16 sps:$4 sm:$0xff]   ;;  %v849_v19 = vld [vmem:[#allocation2 + $0x80] ss:$16 sps:$4 sm:$0xff]  }
  0x2d   :  { %267 = vmatpush1.bf16.msra.mxu0 %v831_v7  ;;  %308 = vmatpush1.bf16.msra.mxu1 %v832_v8  ;;  %v850_v20 = vld [vmem:[#allocation2 + $0x88] ss:$16 sps:$4 sm:$0xff]   ;;  %v851_v21 = vld [vmem:[#allocation2 + $0xa4] ss:$16 sps:$4 sm:$0xff]   ;;  %v853_v22 = vld [vmem:[#allocation2 + $0xac] ss:$16 sps:$4 sm:$0xff]  }
  0x2e   :  { %268 = vmatprep.subr.bf16.mxu0 %v833_v9  ;;  %309 = vmatprep.subr.bf16.mxu1 %v835_v10  ;;  %v855_v23 = vld [vmem:[#allocation2 + $0xa0] ss:$16 sps:$4 sm:$0xff]   ;;  %v856_v24 = vld [vmem:[#allocation2 + $0xa8] ss:$16 sps:$4 sm:$0xff]   ;;  %v857_v25 = vld [vmem:[#allocation2 + $0xc4] ss:$16 sps:$4 sm:$0xff]  }
  0x2f   :  { %v859_v26 = vld [vmem:[#allocation2 + $0xcc] ss:$16 sps:$4 sm:$0xff]   ;;  %v861_v27 = vld [vmem:[#allocation2 + $0xc0] ss:$16 sps:$4 sm:$0xff]   ;;  %v862_v28 = vld [vmem:[#allocation2 + $0xc8] ss:$16 sps:$4 sm:$0xff]  }
  0x30   :  { %v863_v29 = vld [vmem:[#allocation2 + $0xe4] ss:$16 sps:$4 sm:$0xff]   ;;  %v865_v30 = vld [vmem:[#allocation2 + $0xec] ss:$16 sps:$4 sm:$0xff]   ;;  %v867_v31 = vld [vmem:[#allocation2 + $0xe0] ss:$16 sps:$4 sm:$0xff]  }
  0x31   :  { %269 = vmatpush1.bf16.msra.mxu0 %v837_v11  ;;  %310 = vmatpush1.bf16.msra.mxu1 %v838_v12  ;;  %v868_v32 = vld [vmem:[#allocation2 + $0xe8] ss:$16 sps:$4 sm:$0xff]   ;;  %v869_v33 = vld [vmem:[#allocation4 + $0x40] sm:$0xff]   ;;  %v877_v42 = vld [vmem:[#allocation4 + $0x50] sm:$0xff]   ;;  %v85_v3 = vshrl.u32 %v84_v2, 7 }
  0x32   :  { %270 = vmatprep.subr.bf16.mxu0 %v839_v13  ;;  %311 = vmatprep.subr.bf16.mxu1 %v841_v14  ;;  %v870_v34 = vld [vmem:[#allocation4 + $0xc0] sm:$0xff]   ;;  %v874_v39 = vld [vmem:[#allocation4 + $0xc8] sm:$0xff]   ;;  %v878_v43 = vld [vmem:[#allocation4 + $0xd0] sm:$0xff]  }
  0x33   :  { %v49_v35 = vld [vmem:[%s1022_s0] sm:$0x3]  ;;  %v875_v40 = vld [vmem:[#allocation4 + $0x8] sm:$0xff]   ;;  %v879_v44 = vld [vmem:[#allocation4 + $0x10] sm:$0xff]   ;;  %v86_v4 = vsub.s32 0, %v85_v3  ;;  %v94_v5 = vsub.s32 2, %v85_v3 }
  0x34   :  { %v871_v36 = vld [vmem:[#allocation4] sm:$0xff]   ;;  %v876_v41 = vld [vmem:[#allocation4 + $0x88] sm:$0xff]   ;;  %v880_v45 = vld [vmem:[#allocation4 + $0x90] sm:$0xff]   ;;  %v90_v7 = vsub.s32 1, %v85_v3  ;;  %v98_v8 = vsub.s32 3, %v85_v3 }
  0x35   :  { %271 = vmatpush1.bf16.msra.mxu0 %v843_v15  ;;  %312 = vmatpush1.bf16.msra.mxu1 %v844_v16  ;;  %v872_v37 = vld [vmem:[#allocation4 + $0x80] sm:$0xff]   ;;  %v881_v46 = vld [vmem:[#allocation4 + $0x58] sm:$0xff]   ;;  %v889_v54 = vld [vmem:[#allocation4 + $0x68] sm:$0xff]  }
  0x36   :  { %272 = vmatprep.subr.bf16.mxu0 %v845_v17  ;;  %313 = vmatprep.subr.bf16.mxu1 %v847_v18  ;;  %v882_v47 = vld [vmem:[#allocation4 + $0xd8] sm:$0xff]   ;;  %v885_v50 = vld [vmem:[#allocation4 + $0x60] sm:$0xff]   ;;  %v890_v55 = vld [vmem:[#allocation4 + $0xe8] sm:$0xff]  }
  0x37   :  { %v883_v48 = vld [vmem:[#allocation4 + $0x18] sm:$0xff]   ;;  %v886_v51 = vld [vmem:[#allocation4 + $0xe0] sm:$0xff]   ;;  %v891_v56 = vld [vmem:[#allocation4 + $0x28] sm:$0xff]  }
  0x38   :  { %v884_v49 = vld [vmem:[#allocation4 + $0x98] sm:$0xff]   ;;  %v887_v52 = vld [vmem:[#allocation4 + $0x20] sm:$0xff]   ;;  %v892_v57 = vld [vmem:[#allocation4 + $0xa8] sm:$0xff]  }
  0x39   :  { %273 = vmatpush1.bf16.msra.mxu0 %v849_v19  ;;  %314 = vmatpush1.bf16.msra.mxu1 %v850_v20  ;;  %v888_v53 = vld [vmem:[#allocation4 + $0xa0] sm:$0xff]   ;;  %v893_v58 = vld [vmem:[#allocation4 + $0x70] sm:$0xff]   ;;  %v897_v62 = vld [vmem:[#allocation4 + $0x78] sm:$0xff]  }
  0x3a   :  { %274 = vmatprep.subr.bf16.mxu0 %v851_v21  ;;  %315 = vmatprep.subr.bf16.mxu1 %v853_v22  ;;  %v894_v59 = vld [vmem:[#allocation4 + $0xf0] sm:$0xff]   ;;  %v898_v63 = vld [vmem:[#allocation4 + $0xf8] sm:$0xff]   ;;  %v82_v6 = vld [vmem:[%s1024_s2] sm:$0xf] }
  0x3b   :  { %v895_v60 = vld [vmem:[#allocation4 + $0x30] sm:$0xff]   ;;  %v899_v0 = vld [vmem:[#allocation4 + $0x38] sm:$0xff]   ;;  %v87_v9 = vrot.slane %v82_v6, %v86_v4  ;;  %v95_v10 = vrot.slane %v82_v6, %v94_v5  ;;  %v91_v11 = vrot.slane %v82_v6, %v90_v7  ;;  %v99_v12 = vrot.slane %v82_v6, %v98_v8 }
  0x3c   :  { %v896_v61 = vld [vmem:[#allocation4 + $0xb0] sm:$0xff]   ;;  %v900_v1 = vld [vmem:[#allocation4 + $0xb8] sm:$0xff]  }
  0x3d   :  { %275 = vmatpush1.bf16.msra.mxu0 %v855_v23  ;;  %316 = vmatpush1.bf16.msra.mxu1 %v856_v24 }
  0x3e   :  { %276 = vmatprep.subr.bf16.mxu0 %v857_v25  ;;  %317 = vmatprep.subr.bf16.mxu1 %v859_v26 }
  0x41   :  { %277 = vmatpush1.bf16.msra.mxu0 %v861_v27  ;;  %318 = vmatpush1.bf16.msra.mxu1 %v862_v28 }
  0x42   :  { %278 = vmatprep.subr.bf16.mxu0 %v863_v29  ;;  %319 = vmatprep.subr.bf16.mxu1 %v865_v30 }
  0x45   :  { %279 = vmatpush1.bf16.msra.mxu0 %v867_v31  ;;  %320 = vmatpush1.bf16.msra.mxu1 %v868_v32 }
  0x46   :  { %770 = vmatprep.subr.bf16.mxu0 %v869_v33  ;;  %792 = vmatprep.subr.bf16.mxu1 %v870_v34 }
  0x48   :  { %297 = vmatmul.mubr.bf16.vlgmr.msra.gmra.mrb[0].mxu0 %v49_v35  ;;  %338 = vmatmul.mubr.bf16.vlgmr.msra.gmra.mrb[0].mxu1 %v49_v35  ;;  %v737_v35 = vld [vmem:[%s1026_s4] ss:$0 sm:$0xff] }
  0x49   :  { %771 = vmatpush3.bf16.msra.mxu0 %v871_v36  ;;  %793 = vmatpush3.bf16.msra.mxu1 %v872_v37 }
  0x4a   :  { %772 = vmatprep.subr.bf16.mxu0 %v873_v38  ;;  %794 = vmatprep.subr.bf16.mxu1 %v874_v39 }
  0x4d   :  { %773 = vmatpush3.bf16.msra.mxu0 %v875_v40  ;;  %795 = vmatpush3.bf16.msra.mxu1 %v876_v41 }
  0x4e   :  { %774 = vmatprep.subr.bf16.mxu0 %v877_v42  ;;  %796 = vmatprep.subr.bf16.mxu1 %v878_v43 }
  0x51   :  { %775 = vmatpush3.bf16.msra.mxu0 %v879_v44  ;;  %797 = vmatpush3.bf16.msra.mxu1 %v880_v45 }
  0x52   :  { %776 = vmatprep.subr.bf16.mxu0 %v881_v46  ;;  %798 = vmatprep.subr.bf16.mxu1 %v882_v47 }
  0x55   :  { %777 = vmatpush3.bf16.msra.mxu0 %v883_v48  ;;  %799 = vmatpush3.bf16.msra.mxu1 %v884_v49 }
  0x56   :  { %778 = vmatprep.subr.bf16.mxu0 %v885_v50  ;;  %800 = vmatprep.subr.bf16.mxu1 %v886_v51 }
  0x59   :  { %779 = vmatpush3.bf16.msra.mxu0 %v887_v52  ;;  %801 = vmatpush3.bf16.msra.mxu1 %v888_v53 }
  0x5a   :  { %780 = vmatprep.subr.bf16.mxu0 %v889_v54  ;;  %802 = vmatprep.subr.bf16.mxu1 %v890_v55 }
  0x5d   :  { %781 = vmatpush3.bf16.msra.mxu0 %v891_v56  ;;  %803 = vmatpush3.bf16.msra.mxu1 %v892_v57 }
  0x5e   :  { %782 = vmatprep.subr.bf16.mxu0 %v893_v58  ;;  %804 = vmatprep.subr.bf16.mxu1 %v894_v59 }
  0x61   :  { %783 = vmatpush3.bf16.msra.mxu0 %v895_v60  ;;  %805 = vmatpush3.bf16.msra.mxu1 %v896_v61 }
  0x62   :  { %784 = vmatprep.subr.bf16.mxu0 %v897_v62  ;;  %806 = vmatprep.subr.bf16.mxu1 %v898_v63 }
  0x65   :  { %785 = vmatpush3.bf16.msra.mxu0 %v899_v0  ;;  %807 = vmatpush3.bf16.msra.mxu1 %v900_v1 }
 0x11b   :  { %v298_v13 = vpop.f32.mrb[0].mxu0  ;;  %v339_v14 = vpop.f32.mrb[0].mxu1 }
 0x11c   :  { %v299_v15 = vadd.f32 %v298_v13, %v87_v9  ;;  %v340_v16 = vadd.f32 %v339_v14, %v95_v10  ;;  %v300_v17 = vpop.f32.mrb[1].mxu0  ;;  %v341_v18 = vpop.f32.mrb[1].mxu1 }
 0x11d   :  { %v301_v19 = vadd.f32 %v300_v17, %v91_v11  ;;  %v342_v20 = vadd.f32 %v341_v18, %v99_v12  ;;  %v302_v21 = vpop.f32.mrb[2].mxu0  ;;  %v343_v22 = vpop.f32.mrb[2].mxu1 }
 0x11e   :  { %v346_v23 = vmax.f32 %v299_v15, 0.0  ;;  %v348_v24 = vmax.f32 %v340_v16, 0.0  ;;  %v303_v25 = vpop.f32.mrb[3].mxu0  ;;  %v344_v26 = vpop.f32.mrb[3].mxu1 }
 0x11f   :  { %v347_v27 = vmax.f32 %v301_v19, 0.0  ;;  %v349_v28 = vmax.f32 %v342_v20, 0.0 }
 0x120   :  { %v352_v29 = vpack.c.bf16 %v348_v24, %v348_v24  ;;  %v350_v32 = vpack.c.bf16 %v346_v23, %v346_v23 }
 0x121   :  { %v351_v30 = vpack.c.bf16 %v347_v27, %v347_v27  ;;  %v353_v31 = vpack.c.bf16 %v349_v28, %v349_v28 }
 0x123   :  { %649 = vmatprep.mubr.bf16.mxu0 %v351_v30  ;;  %689 = vmatprep.mubr.bf16.mxu1 %v353_v31 }
 0x124   :  { %650 = vmatmul.mubr.bf16.vlgmr.msra.gmra.mrb[4].mxu0 %v350_v32  ;;  %690 = vmatmul.mubr.bf16.vlgmr.msra.gmra.mrb[4].mxu1 %v352_v29 }
 0x1f7   :  { %v786_v33 = vpop.f32.mrb[4].mxu0  ;;  %v808_v34 = vpop.f32.mrb[4].mxu1 }
 0x1f8   :  { %v787_v36 = vpop.f32.mrb[5].mxu0  ;;  %v809_v37 = vpop.f32.mrb[5].mxu1 }
 0x1f9   :  { %v788_v38 = vadd.f32 %v787_v36, %v786_v33  ;;  %v810_v39 = vadd.f32 %v809_v37, %v808_v34  ;;  %v789_v40 = vpop.f32.mrb[6].mxu0  ;;  %v811_v41 = vpop.f32.mrb[6].mxu1 }
 0x1fa   :  { %v790_v42 = vpop.f32.mrb[7].mxu0  ;;  %v812_v43 = vpop.f32.mrb[7].mxu1 }
 0x1fb   :  { %v652_v44 = vadd.f32 %v788_v38, %v737_v35 }
 0x1fd   :  { %v692_v45 = vadd.f32 %v810_v39, %v652_v44 }
 0x1ff   :  { %v697_v46 = vpack.c.bf16 %v692_v45, %v692_v45 }
 0x201   :  { %698 = vst [vmem:[%s1027_s5] sm:$0x3] %v697_v46 }
 0x202   :  { %703 = vsyncpa [#allocation3], 1 }
 0x203   :  { %704 = vsyncpa [#allocation5], 1 }

</bundles_post_ra>
